<compile_context>
chip_gen: v6e
topology: v6e:2x2x1
jax: 0.10.0
libtpu: 0.0.40
codegen_flags: <defaults>
</compile_context>

<pallas_src>
import jax
import jax.numpy as jnp
from jax import lax
from jax.experimental import pallas as pl
from jax.experimental.pallas import tpu as pltpu

# ---- synthetic base-model config (small, deterministic) ---------------------
BATCH = 2
SEQ = 8
HIDDEN = 32
FFN = 4 * HIDDEN          # 128
VOCAB = 64
LN_EPS = 1e-5


def _layernorm(x, gamma, beta):
    mu = jnp.mean(x, axis=-1, keepdims=True)
    var = jnp.mean((x - mu) ** 2, axis=-1, keepdims=True)
    return (x - mu) * lax.rsqrt(var + LN_EPS) * gamma + beta


def _export_kernel(ids_ref, wte_ref, wpe_ref, wqkvo_ref, w1_ref, w2_ref, ln_ref,
                   o_ref):
    ROWS = BATCH * SEQ

    # --- embedding gather as a one-hot matmul (MXU), positional add ----------
    ids = ids_ref[...]                                            # [B*S, 1] int32
    vocab_iota = lax.broadcasted_iota(jnp.int32, (ROWS, VOCAB), 1)
    onehot = (vocab_iota == ids).astype(jnp.float32)              # [B*S, V]
    x_tok = jnp.dot(onehot, wte_ref[...],
                    preferred_element_type=jnp.float32)           # [B*S, H]
    pos = jnp.concatenate([wpe_ref[...]] * BATCH, axis=0)         # [B*S, H]
    x2d = x_tok + pos                                             # [B*S, H]

    ln = ln_ref[...]                                              # [6, H]

    def last_rows(a):
        # rows (SEQ-1), (2*SEQ-1), ...  ->  [B, H]  (static sublane slices)
        return jnp.concatenate(
            [a[b * SEQ + SEQ - 1:b * SEQ + SEQ, :] for b in range(BATCH)],
            axis=0)

    # --- attention-input layernorm over all rows (K/V need the full seq) -----
    xn = _layernorm(x2d, ln[0:1, :], ln[1:2, :])                  # [B*S, H]
    xn_last = last_rows(xn)                                       # [B, H]
    x_last = last_rows(x2d)                                       # [B, H]

    # --- separate Q/K/V projections (each [*, H] x [H, H] on the MXU) --------
    # Only the last-token query is ever needed (seq_emb = model_out[:, -1, :]),
    # and the causal mask is a no-op for the last row, so it is dropped.
    q_last = jnp.dot(xn_last, wqkvo_ref[0],
                     preferred_element_type=jnp.float32)          # [B, H]
    k = jnp.dot(xn, wqkvo_ref[1], preferred_element_type=jnp.float32)  # [B*S, H]
    v = jnp.dot(xn, wqkvo_ref[2], preferred_element_type=jnp.float32)  # [B*S, H]

    scale = 1.0 / jnp.sqrt(jnp.float32(HIDDEN))
    attn_rows = []
    for b in range(BATCH):                                        # unrolled, B=2
        q_b = q_last[b:b + 1, :]                                  # [1, H]
        k_b = k[b * SEQ:(b + 1) * SEQ, :]                         # [S, H]
        v_b = v[b * SEQ:(b + 1) * SEQ, :]                         # [S, H]
        s_b = lax.dot_general(q_b, k_b, (((1,), (1,)), ((), ())),
                              preferred_element_type=jnp.float32) * scale  # [1, S]
        m_b = jnp.max(s_b, axis=-1, keepdims=True)
        p_b = jnp.exp(s_b - m_b)
        p_b = p_b / jnp.sum(p_b, axis=-1, keepdims=True)          # exact divide
        attn_rows.append(
            jnp.dot(p_b, v_b, preferred_element_type=jnp.float32))  # [1, H]
    attn = jnp.concatenate(attn_rows, axis=0)                     # [B, H]

    # --- residual + output projection (last token only) ----------------------
    x_last = x_last + jnp.dot(attn, wqkvo_ref[3],
                              preferred_element_type=jnp.float32)  # [B, H]

    # --- MLP (last token only) ------------------------------------------------
    xn2 = _layernorm(x_last, ln[2:3, :], ln[3:4, :])
    h = jnp.dot(xn2, w1_ref[...], preferred_element_type=jnp.float32)  # [B, FFN]
    # Synthetic base model uses the tanh GELU (GPT-2 "gelu_new").
    # TODO(synk): switch to exact-erf GELU if the reference base model uses
    # PyTorch nn.GELU's default (erf) form.
    h = jax.nn.gelu(h, approximate=True)
    x_last = x_last + jnp.dot(h, w2_ref[...],
                              preferred_element_type=jnp.float32)

    # --- final layernorm (model_out[:, -1, :]) -> single [B, H] store --------
    o_ref[...] = _layernorm(x_last, ln[4:5, :], ln[5:6, :])


@jax.jit
def export_model_forward(input_ids, params):
    """Returns (seq_emb [B, H], output_embeddings [V, H])."""
    B, S = input_ids.shape
    assert (B, S) == (BATCH, SEQ)

    # Row-major flatten (free bitcast); the gather itself happens in-kernel.
    ids2d = input_ids.reshape(B * S, 1).astype(jnp.int32)

    vmem = pltpu.MemorySpace.VMEM
    seq_emb = pl.pallas_call(
        _export_kernel,
        out_shape=jax.ShapeDtypeStruct((B, HIDDEN), jnp.float32),
        in_specs=[pl.BlockSpec(memory_space=vmem)] * 7,
        out_specs=pl.BlockSpec(memory_space=vmem),
    )(
        ids2d,
        params["wte"], params["wpe"],
        params["wqkvo"], params["w1"], params["w2"],
        params["ln"],
    )

    output_embeddings = params["lm_head"]                          # [V, H]
    return seq_emb, output_embeddings


def init_params(key):
    ks = jax.random.split(key, 10)
    std = 0.02
    wq = jax.random.normal(ks[2], (HIDDEN, HIDDEN), jnp.float32) * std
    wk = jax.random.normal(ks[3], (HIDDEN, HIDDEN), jnp.float32) * std
    wv = jax.random.normal(ks[4], (HIDDEN, HIDDEN), jnp.float32) * std
    wo = jax.random.normal(ks[5], (HIDDEN, HIDDEN), jnp.float32) * std
    ones = jnp.ones((HIDDEN,), jnp.float32)
    zeros = jnp.zeros((HIDDEN,), jnp.float32)
    p = {
        "wte": jax.random.normal(ks[0], (VOCAB, HIDDEN), jnp.float32) * std,
        "wpe": jax.random.normal(ks[1], (SEQ, HIDDEN), jnp.float32) * std,
        # Q/K/V/O weights pre-fused ONCE here (not per forward call).
        "wqkvo": jnp.stack([wq, wk, wv, wo], axis=0),              # [4, H, H]
        "w1": jax.random.normal(ks[6], (HIDDEN, FFN), jnp.float32) * std,
        "w2": jax.random.normal(ks[7], (FFN, HIDDEN), jnp.float32) * std,
        # PyTorch nn.Linear(HIDDEN, VOCAB).weight is [VOCAB, HIDDEN]
        "lm_head": jax.random.normal(ks[8], (VOCAB, HIDDEN), jnp.float32) * std,
        # LN params packed: rows = ln1_g, ln1_b, ln2_g, ln2_b, lnf_g, lnf_b
        "ln": jnp.stack([ones, zeros, ones, zeros, ones, zeros], axis=0),  # [6, H]
    }
    return p


if __name__ == "__main__":
    key = jax.random.PRNGKey(0)
    k_ids, k_params = jax.random.split(key)

    input_ids = jax.random.randint(k_ids, (BATCH, SEQ), 0, VOCAB, dtype=jnp.int32)
    params = init_params(k_params)

    seq_emb, output_embeddings = export_model_forward(input_ids, params)
    jax.block_until_ready((seq_emb, output_embeddings))

    assert seq_emb.shape == (BATCH, HIDDEN)
    assert output_embeddings.shape == (VOCAB, HIDDEN)
    assert bool(jnp.all(jnp.isfinite(seq_emb)))
    print("KERNEL_OK")
</pallas_src>

<mosaic_0001>
module attributes {stable_mosaic.version = 11 : i64} {
  func.func @_export_kernel(%arg0: memref<16x1xi32, #tpu.memory_space<vmem>>, %arg1: memref<64x32xf32, #tpu.memory_space<vmem>>, %arg2: memref<8x32xf32, #tpu.memory_space<vmem>>, %arg3: memref<4x32x32xf32, #tpu.memory_space<vmem>>, %arg4: memref<32x128xf32, #tpu.memory_space<vmem>>, %arg5: memref<128x32xf32, #tpu.memory_space<vmem>>, %arg6: memref<6x32xf32, #tpu.memory_space<vmem>>, %arg7: memref<2x32xf32, #tpu.memory_space<vmem>>) attributes {dimension_semantics = [], scalar_prefetch = 0 : i64, scratch_operands = 0 : i64, tpu.core_type = #tpu.core_type<tc>} {
    %c0 = arith.constant 0 : index
    %c0_0 = arith.constant 0 : index
    %0 = vector.load %arg0[%c0, %c0_0] : memref<16x1xi32, #tpu.memory_space<vmem>>, vector<16x1xi32>
    %1 = tpu.iota {dimensions = array<i32: 1>} : vector<16x64xi32>
    %2 = vector.broadcast %0 : vector<16x1xi32> to vector<16x64xi32>
    %3 = arith.cmpi eq, %1, %2 : vector<16x64xi32>
    %4 = arith.extui %3 : vector<16x64xi1> to vector<16x64xi32>
    %5 = arith.sitofp %4 : vector<16x64xi32> to vector<16x64xf32>
    %c0_1 = arith.constant 0 : index
    %c0_2 = arith.constant 0 : index
    %6 = vector.load %arg1[%c0_1, %c0_2] : memref<64x32xf32, #tpu.memory_space<vmem>>, vector<64x32xf32>
    %cst = arith.constant dense<0.000000e+00> : vector<16x32xf32>
    %7 = tpu.matmul %5, %6, %cst {dimension_numbers = #tpu.dot_dimension_numbers<[1], [0], [0], [1], [0, 0, 1, 1], [], []>} : vector<16x64xf32>, vector<64x32xf32>, vector<16x32xf32> -> vector<16x32xf32>
    %c0_3 = arith.constant 0 : index
    %c0_4 = arith.constant 0 : index
    %8 = vector.load %arg2[%c0_3, %c0_4] : memref<8x32xf32, #tpu.memory_space<vmem>>, vector<8x32xf32>
    %9 = tpu.concatenate %8, %8 in 0 : vector<8x32xf32>, vector<8x32xf32> -> vector<16x32xf32>
    %10 = arith.addf %7, %9 : vector<16x32xf32>
    %c0_5 = arith.constant 0 : index
    %c0_6 = arith.constant 0 : index
    %11 = vector.load %arg6[%c0_5, %c0_6] : memref<6x32xf32, #tpu.memory_space<vmem>>, vector<6x32xf32>
    %12 = vector.extract_strided_slice %11 {offsets = [0, 0], sizes = [1, 32], strides = [1, 1]} : vector<6x32xf32> to vector<1x32xf32>
    %13 = vector.extract_strided_slice %11 {offsets = [1, 0], sizes = [1, 32], strides = [1, 1]} : vector<6x32xf32> to vector<1x32xf32>
    %cst_7 = arith.constant dense<0.000000e+00> : vector<16xf32>
    %14 = vector.multi_reduction <add>, %10, %cst_7 [1] : vector<16x32xf32> to vector<16xf32>
    %15 = vector.shape_cast %14 : vector<16xf32> to vector<16x1xf32>
    %cst_8 = arith.constant 3.200000e+01 : f32
    %16 = vector.broadcast %cst_8 : f32 to vector<16x1xf32>
    %17 = arith.divf %15, %16 : vector<16x1xf32>
    %18 = vector.broadcast %17 : vector<16x1xf32> to vector<16x32xf32>
    %19 = arith.subf %10, %18 : vector<16x32xf32>
    %20 = arith.mulf %19, %19 : vector<16x32xf32>
    %cst_9 = arith.constant dense<0.000000e+00> : vector<16xf32>
    %21 = vector.multi_reduction <add>, %20, %cst_9 [1] : vector<16x32xf32> to vector<16xf32>
    %22 = vector.shape_cast %21 : vector<16xf32> to vector<16x1xf32>
    %cst_10 = arith.constant 3.200000e+01 : f32
    %23 = vector.broadcast %cst_10 : f32 to vector<16x1xf32>
    %24 = arith.divf %22, %23 : vector<16x1xf32>
    %25 = vector.broadcast %17 : vector<16x1xf32> to vector<16x32xf32>
    %26 = arith.subf %10, %25 : vector<16x32xf32>
    %cst_11 = arith.constant 9.99999974E-6 : f32
    %27 = vector.broadcast %cst_11 : f32 to vector<16x1xf32>
    %28 = arith.addf %24, %27 : vector<16x1xf32>
    %29 = math.rsqrt %28 : vector<16x1xf32>
    %30 = vector.broadcast %29 : vector<16x1xf32> to vector<16x32xf32>
    %31 = arith.mulf %26, %30 : vector<16x32xf32>
    %32 = vector.broadcast %12 : vector<1x32xf32> to vector<16x32xf32>
    %33 = arith.mulf %31, %32 : vector<16x32xf32>
    %34 = vector.broadcast %13 : vector<1x32xf32> to vector<16x32xf32>
    %35 = arith.addf %33, %34 : vector<16x32xf32>
    %36 = vector.extract_strided_slice %35 {offsets = [7, 0], sizes = [1, 32], strides = [1, 1]} : vector<16x32xf32> to vector<1x32xf32>
    %37 = vector.extract_strided_slice %35 {offsets = [15, 0], sizes = [1, 32], strides = [1, 1]} : vector<16x32xf32> to vector<1x32xf32>
    %38 = tpu.concatenate %36, %37 in 0 : vector<1x32xf32>, vector<1x32xf32> -> vector<2x32xf32>
    %39 = vector.extract_strided_slice %10 {offsets = [7, 0], sizes = [1, 32], strides = [1, 1]} : vector<16x32xf32> to vector<1x32xf32>
    %40 = vector.extract_strided_slice %10 {offsets = [15, 0], sizes = [1, 32], strides = [1, 1]} : vector<16x32xf32> to vector<1x32xf32>
    %41 = tpu.concatenate %39, %40 in 0 : vector<1x32xf32>, vector<1x32xf32> -> vector<2x32xf32>
    %c0_12 = arith.constant 0 : index
    %c0_13 = arith.constant 0 : index
    %c0_14 = arith.constant 0 : index
    %42 = vector.load %arg3[%c0_12, %c0_13, %c0_14] : memref<4x32x32xf32, #tpu.memory_space<vmem>>, vector<1x32x32xf32>
    %43 = vector.shape_cast %42 : vector<1x32x32xf32> to vector<32x32xf32>
    %cst_15 = arith.constant dense<0.000000e+00> : vector<2x32xf32>
    %44 = tpu.matmul %38, %43, %cst_15 {dimension_numbers = #tpu.dot_dimension_numbers<[1], [0], [0], [1], [0, 0, 1, 1], [], []>} : vector<2x32xf32>, vector<32x32xf32>, vector<2x32xf32> -> vector<2x32xf32>
    %c1 = arith.constant 1 : index
    %c0_16 = arith.constant 0 : index
    %c0_17 = arith.constant 0 : index
    %45 = vector.load %arg3[%c1, %c0_16, %c0_17] : memref<4x32x32xf32, #tpu.memory_space<vmem>>, vector<1x32x32xf32>
    %46 = vector.shape_cast %45 : vector<1x32x32xf32> to vector<32x32xf32>
    %cst_18 = arith.constant dense<0.000000e+00> : vector<16x32xf32>
    %47 = tpu.matmul %35, %46, %cst_18 {dimension_numbers = #tpu.dot_dimension_numbers<[1], [0], [0], [1], [0, 0, 1, 1], [], []>} : vector<16x32xf32>, vector<32x32xf32>, vector<16x32xf32> -> vector<16x32xf32>
    %c2 = arith.constant 2 : index
    %c0_19 = arith.constant 0 : index
    %c0_20 = arith.constant 0 : index
    %48 = vector.load %arg3[%c2, %c0_19, %c0_20] : memref<4x32x32xf32, #tpu.memory_space<vmem>>, vector<1x32x32xf32>
    %49 = vector.shape_cast %48 : vector<1x32x32xf32> to vector<32x32xf32>
    %cst_21 = arith.constant dense<0.000000e+00> : vector<16x32xf32>
    %50 = tpu.matmul %35, %49, %cst_21 {dimension_numbers = #tpu.dot_dimension_numbers<[1], [0], [0], [1], [0, 0, 1, 1], [], []>} : vector<16x32xf32>, vector<32x32xf32>, vector<16x32xf32> -> vector<16x32xf32>
    %cst_22 = arith.constant 3.200000e+01 : f32
    %51 = math.sqrt %cst_22 : f32
    %cst_23 = arith.constant 1.000000e+00 : f32
    %52 = arith.divf %cst_23, %51 : f32
    %53 = vector.extract_strided_slice %44 {offsets = [0, 0], sizes = [1, 32], strides = [1, 1]} : vector<2x32xf32> to vector<1x32xf32>
    %54 = vector.extract_strided_slice %47 {offsets = [0, 0], sizes = [8, 32], strides = [1, 1]} : vector<16x32xf32> to vector<8x32xf32>
    %55 = vector.extract_strided_slice %50 {offsets = [0, 0], sizes = [8, 32], strides = [1, 1]} : vector<16x32xf32> to vector<8x32xf32>
    %cst_24 = arith.constant dense<0.000000e+00> : vector<1x8xf32>
    %56 = tpu.matmul %53, %54, %cst_24 {dimension_numbers = #tpu.dot_dimension_numbers<[1], [1], [0], [0], [0, 0, 1, 0], [], []>} : vector<1x32xf32>, vector<8x32xf32>, vector<1x8xf32> -> vector<1x8xf32>
    %57 = vector.broadcast %52 : f32 to vector<1x8xf32>
    %58 = arith.mulf %56, %57 : vector<1x8xf32>
    %cst_25 = arith.constant dense<0xFF800000> : vector<1xf32>
    %59 = vector.multi_reduction <maximumf>, %58, %cst_25 [1] : vector<1x8xf32> to vector<1xf32>
    %60 = vector.shape_cast %59 : vector<1xf32> to vector<1x1xf32>
    %61 = vector.broadcast %60 : vector<1x1xf32> to vector<1x8xf32>
    %62 = arith.subf %58, %61 : vector<1x8xf32>
    %63 = math.exp %62 : vector<1x8xf32>
    %cst_26 = arith.constant dense<0.000000e+00> : vector<1xf32>
    %64 = vector.multi_reduction <add>, %63, %cst_26 [1] : vector<1x8xf32> to vector<1xf32>
    %65 = vector.shape_cast %64 : vector<1xf32> to vector<1x1xf32>
    %66 = vector.broadcast %65 : vector<1x1xf32> to vector<1x8xf32>
    %67 = arith.divf %63, %66 : vector<1x8xf32>
    %cst_27 = arith.constant dense<0.000000e+00> : vector<1x32xf32>
    %68 = tpu.matmul %67, %55, %cst_27 {dimension_numbers = #tpu.dot_dimension_numbers<[1], [0], [0], [1], [0, 0, 1, 1], [], []>} : vector<1x8xf32>, vector<8x32xf32>, vector<1x32xf32> -> vector<1x32xf32>
    %69 = vector.extract_strided_slice %44 {offsets = [1, 0], sizes = [1, 32], strides = [1, 1]} : vector<2x32xf32> to vector<1x32xf32>
    %70 = vector.extract_strided_slice %47 {offsets = [8, 0], sizes = [8, 32], strides = [1, 1]} : vector<16x32xf32> to vector<8x32xf32>
    %71 = vector.extract_strided_slice %50 {offsets = [8, 0], sizes = [8, 32], strides = [1, 1]} : vector<16x32xf32> to vector<8x32xf32>
    %cst_28 = arith.constant dense<0.000000e+00> : vector<1x8xf32>
    %72 = tpu.matmul %69, %70, %cst_28 {dimension_numbers = #tpu.dot_dimension_numbers<[1], [1], [0], [0], [0, 0, 1, 0], [], []>} : vector<1x32xf32>, vector<8x32xf32>, vector<1x8xf32> -> vector<1x8xf32>
    %73 = vector.broadcast %52 : f32 to vector<1x8xf32>
    %74 = arith.mulf %72, %73 : vector<1x8xf32>
    %cst_29 = arith.constant dense<0xFF800000> : vector<1xf32>
    %75 = vector.multi_reduction <maximumf>, %74, %cst_29 [1] : vector<1x8xf32> to vector<1xf32>
    %76 = vector.shape_cast %75 : vector<1xf32> to vector<1x1xf32>
    %77 = vector.broadcast %76 : vector<1x1xf32> to vector<1x8xf32>
    %78 = arith.subf %74, %77 : vector<1x8xf32>
    %79 = math.exp %78 : vector<1x8xf32>
    %cst_30 = arith.constant dense<0.000000e+00> : vector<1xf32>
    %80 = vector.multi_reduction <add>, %79, %cst_30 [1] : vector<1x8xf32> to vector<1xf32>
    %81 = vector.shape_cast %80 : vector<1xf32> to vector<1x1xf32>
    %82 = vector.broadcast %81 : vector<1x1xf32> to vector<1x8xf32>
    %83 = arith.divf %79, %82 : vector<1x8xf32>
    %cst_31 = arith.constant dense<0.000000e+00> : vector<1x32xf32>
    %84 = tpu.matmul %83, %71, %cst_31 {dimension_numbers = #tpu.dot_dimension_numbers<[1], [0], [0], [1], [0, 0, 1, 1], [], []>} : vector<1x8xf32>, vector<8x32xf32>, vector<1x32xf32> -> vector<1x32xf32>
    %85 = tpu.concatenate %68, %84 in 0 : vector<1x32xf32>, vector<1x32xf32> -> vector<2x32xf32>
    %c3 = arith.constant 3 : index
    %c0_32 = arith.constant 0 : index
    %c0_33 = arith.constant 0 : index
    %86 = vector.load %arg3[%c3, %c0_32, %c0_33] : memref<4x32x32xf32, #tpu.memory_space<vmem>>, vector<1x32x32xf32>
    %87 = vector.shape_cast %86 : vector<1x32x32xf32> to vector<32x32xf32>
    %cst_34 = arith.constant dense<0.000000e+00> : vector<2x32xf32>
    %88 = tpu.matmul %85, %87, %cst_34 {dimension_numbers = #tpu.dot_dimension_numbers<[1], [0], [0], [1], [0, 0, 1, 1], [], []>} : vector<2x32xf32>, vector<32x32xf32>, vector<2x32xf32> -> vector<2x32xf32>
    %89 = arith.addf %41, %88 : vector<2x32xf32>
    %90 = vector.extract_strided_slice %11 {offsets = [2, 0], sizes = [1, 32], strides = [1, 1]} : vector<6x32xf32> to vector<1x32xf32>
    %91 = vector.extract_strided_slice %11 {offsets = [3, 0], sizes = [1, 32], strides = [1, 1]} : vector<6x32xf32> to vector<1x32xf32>
    %cst_35 = arith.constant dense<0.000000e+00> : vector<2xf32>
    %92 = vector.multi_reduction <add>, %89, %cst_35 [1] : vector<2x32xf32> to vector<2xf32>
    %93 = vector.shape_cast %92 : vector<2xf32> to vector<2x1xf32>
    %cst_36 = arith.constant 3.200000e+01 : f32
    %94 = vector.broadcast %cst_36 : f32 to vector<2x1xf32>
    %95 = arith.divf %93, %94 : vector<2x1xf32>
    %96 = vector.broadcast %95 : vector<2x1xf32> to vector<2x32xf32>
    %97 = arith.subf %89, %96 : vector<2x32xf32>
    %98 = arith.mulf %97, %97 : vector<2x32xf32>
    %cst_37 = arith.constant dense<0.000000e+00> : vector<2xf32>
    %99 = vector.multi_reduction <add>, %98, %cst_37 [1] : vector<2x32xf32> to vector<2xf32>
    %100 = vector.shape_cast %99 : vector<2xf32> to vector<2x1xf32>
    %cst_38 = arith.constant 3.200000e+01 : f32
    %101 = vector.broadcast %cst_38 : f32 to vector<2x1xf32>
    %102 = arith.divf %100, %101 : vector<2x1xf32>
    %103 = vector.broadcast %95 : vector<2x1xf32> to vector<2x32xf32>
    %104 = arith.subf %89, %103 : vector<2x32xf32>
    %cst_39 = arith.constant 9.99999974E-6 : f32
    %105 = vector.broadcast %cst_39 : f32 to vector<2x1xf32>
    %106 = arith.addf %102, %105 : vector<2x1xf32>
    %107 = math.rsqrt %106 : vector<2x1xf32>
    %108 = vector.broadcast %107 : vector<2x1xf32> to vector<2x32xf32>
    %109 = arith.mulf %104, %108 : vector<2x32xf32>
    %110 = vector.broadcast %90 : vector<1x32xf32> to vector<2x32xf32>
    %111 = arith.mulf %109, %110 : vector<2x32xf32>
    %112 = vector.broadcast %91 : vector<1x32xf32> to vector<2x32xf32>
    %113 = arith.addf %111, %112 : vector<2x32xf32>
    %c0_40 = arith.constant 0 : index
    %c0_41 = arith.constant 0 : index
    %114 = vector.load %arg4[%c0_40, %c0_41] : memref<32x128xf32, #tpu.memory_space<vmem>>, vector<32x128xf32>
    %cst_42 = arith.constant dense<0.000000e+00> : vector<2x128xf32>
    %115 = tpu.matmul %113, %114, %cst_42 {dimension_numbers = #tpu.dot_dimension_numbers<[1], [0], [0], [1], [0, 0, 1, 1], [], []>} : vector<2x32xf32>, vector<32x128xf32>, vector<2x128xf32> -> vector<2x128xf32>
    %116 = arith.mulf %115, %115 : vector<2x128xf32>
    %117 = arith.mulf %115, %116 : vector<2x128xf32>
    %cst_43 = arith.constant 4.471500e-02 : f32
    %118 = vector.broadcast %cst_43 : f32 to vector<2x128xf32>
    %119 = arith.mulf %118, %117 : vector<2x128xf32>
    %120 = arith.addf %115, %119 : vector<2x128xf32>
    %cst_44 = arith.constant 0.797884583 : f32
    %121 = vector.broadcast %cst_44 : f32 to vector<2x128xf32>
    %122 = arith.mulf %121, %120 : vector<2x128xf32>
    %123 = math.tanh %122 : vector<2x128xf32>
    %cst_45 = arith.constant 1.000000e+00 : f32
    %124 = vector.broadcast %cst_45 : f32 to vector<2x128xf32>
    %125 = arith.addf %124, %123 : vector<2x128xf32>
    %cst_46 = arith.constant 5.000000e-01 : f32
    %126 = vector.broadcast %cst_46 : f32 to vector<2x128xf32>
    %127 = arith.mulf %126, %125 : vector<2x128xf32>
    %128 = arith.mulf %115, %127 : vector<2x128xf32>
    %c0_47 = arith.constant 0 : index
    %c0_48 = arith.constant 0 : index
    %129 = vector.load %arg5[%c0_47, %c0_48] : memref<128x32xf32, #tpu.memory_space<vmem>>, vector<128x32xf32>
    %cst_49 = arith.constant dense<0.000000e+00> : vector<2x32xf32>
    %130 = tpu.matmul %128, %129, %cst_49 {dimension_numbers = #tpu.dot_dimension_numbers<[1], [0], [0], [1], [0, 0, 1, 1], [], []>} : vector<2x128xf32>, vector<128x32xf32>, vector<2x32xf32> -> vector<2x32xf32>
    %131 = arith.addf %89, %130 : vector<2x32xf32>
    %132 = vector.extract_strided_slice %11 {offsets = [4, 0], sizes = [1, 32], strides = [1, 1]} : vector<6x32xf32> to vector<1x32xf32>
    %133 = vector.extract_strided_slice %11 {offsets = [5, 0], sizes = [1, 32], strides = [1, 1]} : vector<6x32xf32> to vector<1x32xf32>
    %cst_50 = arith.constant dense<0.000000e+00> : vector<2xf32>
    %134 = vector.multi_reduction <add>, %131, %cst_50 [1] : vector<2x32xf32> to vector<2xf32>
    %135 = vector.shape_cast %134 : vector<2xf32> to vector<2x1xf32>
    %cst_51 = arith.constant 3.200000e+01 : f32
    %136 = vector.broadcast %cst_51 : f32 to vector<2x1xf32>
    %137 = arith.divf %135, %136 : vector<2x1xf32>
    %138 = vector.broadcast %137 : vector<2x1xf32> to vector<2x32xf32>
    %139 = arith.subf %131, %138 : vector<2x32xf32>
    %140 = arith.mulf %139, %139 : vector<2x32xf32>
    %cst_52 = arith.constant dense<0.000000e+00> : vector<2xf32>
    %141 = vector.multi_reduction <add>, %140, %cst_52 [1] : vector<2x32xf32> to vector<2xf32>
    %142 = vector.shape_cast %141 : vector<2xf32> to vector<2x1xf32>
    %cst_53 = arith.constant 3.200000e+01 : f32
    %143 = vector.broadcast %cst_53 : f32 to vector<2x1xf32>
    %144 = arith.divf %142, %143 : vector<2x1xf32>
    %145 = vector.broadcast %137 : vector<2x1xf32> to vector<2x32xf32>
    %146 = arith.subf %131, %145 : vector<2x32xf32>
    %cst_54 = arith.constant 9.99999974E-6 : f32
    %147 = vector.broadcast %cst_54 : f32 to vector<2x1xf32>
    %148 = arith.addf %144, %147 : vector<2x1xf32>
    %149 = math.rsqrt %148 : vector<2x1xf32>
    %150 = vector.broadcast %149 : vector<2x1xf32> to vector<2x32xf32>
    %151 = arith.mulf %146, %150 : vector<2x32xf32>
    %152 = vector.broadcast %132 : vector<1x32xf32> to vector<2x32xf32>
    %153 = arith.mulf %151, %152 : vector<2x32xf32>
    %154 = vector.broadcast %133 : vector<1x32xf32> to vector<2x32xf32>
    %155 = arith.addf %153, %154 : vector<2x32xf32>
    %c0_55 = arith.constant 0 : index
    %c0_56 = arith.constant 0 : index
    %156 = vector.load %arg7[%c0_55, %c0_56] : memref<2x32xf32, #tpu.memory_space<vmem>>, vector<2x32xf32>
    tpu.vector_store %arg7[%c0_55, %c0_56], %155 {strides = array<i32>} : memref<2x32xf32, #tpu.memory_space<vmem>>, vector<2x32xf32>,
    return
  }
}

</mosaic_0001>

<bundles_post_ra>
// kernel: export_model_forward.1
= control target key start
LH: loop header
LB: loop body
LE: loop exit
PB: predicated region body
PF: predicated region fallthrough
CT: control target
= control target key end

     0   :  { %v1338_v2 = vmov 0   ;;  %s1639_s0 = inlined_call_operand.vmem [shape: s32[16,1], index: 0, kind: input, shape index: {}]   ;;  %s1640_s1 = inlined_call_operand.vmem [shape: f32[64,32], index: 1, kind: input, shape index: {}]   ;;  %s1641_s2 = inlined_call_operand.vmem [shape: f32[8,32], index: 2, kind: input, shape index: {}]   ;;  %s1642_s3 = inlined_call_operand.vmem [shape: f32[4,32,32], index: 3, kind: input, shape index: {}]   ;;  %s1643_s4 = inlined_call_operand.vmem [shape: f32[32,128], index: 4, kind: input, shape index: {}]   ;;  %s1644_s5 = inlined_call_operand.vmem [shape: f32[128,32], index: 5, kind: input, shape index: {}]   ;;  %s1645_s6 = inlined_call_operand.vmem [shape: f32[6,32], index: 6, kind: input, shape index: {}]   ;;  %s1646_s7 = inlined_call_operand.hbm [shape: f32[2,32], index: 7, kind: output, shape index: {}]  }
   0x1   :  { %v27_v0 = vld [vmem:[%s1639_s0] sm:$0xff]  ;;  %v50_v1 = vld [vmem:[%s1640_s1 + $0x38] sm:$0xff]  ;;  %1297 = vset.pattern.permute.xlu0 %v1338_v2  ;;  %v49_v3 = vld [vmem:[%s1640_s1 + $0x30] sm:$0xff] }
   0x2   :  { %1164 = vmatprep.subr.mxu1 %v50_v1  ;;  %32 = vperm.xlu0 %1297, %v27_v0   ;;  %v48_v4 = vld [vmem:[%s1640_s1 + $0x28] sm:$0xff] }
   0x3   :  { %1165 = vmatpush3.msra.mxu1 %v50_v1  ;;  %v28_v5 = vld [vmem:[%s1639_s0 + $0x8] sm:$0xff] }
   0x4   :  { %1166 = vmatprep.subr.mxu1 %v49_v3 }
   0x5   :  { %12 = vsyncpa [#allocation3], 0  ;;  %1167 = vmatpush3.msra.mxu1 %v49_v3  ;;  %v47_v6 = vld [vmem:[%s1640_s1 + $0x20] sm:$0xff]  ;;  %v46_v7 = vld [vmem:[%s1640_s1 + $0x18] sm:$0xff]  ;;  %v1339_v11 = vmov 0.0   ;;  %v29_v12 = vlaneseq  ;;  %vm52_vm0 = vcmask 523264  }
   0x6   :  { %1168 = vmatprep.subr.mxu1 %v48_v4  ;;  %35 = vperm.xlu0 %1297, %v28_v5   ;;  %v45_v8 = vld [vmem:[%s1640_s1 + $0x10] sm:$0xff]  ;;  %v44_v9 = vld [vmem:[%s1640_s1 + $0x8] sm:$0xff]  ;;  %v43_v10 = vld [vmem:[%s1640_s1] sm:$0xff]  ;;  %vm135_vm3 = vcmask 261120   ;;  %vm1340_vm4 = vmmov 0   ;;  %vm181_vm5 = vcmask 1040384  }
   0x7   :  { %1169 = vmatpush3.msra.mxu1 %v48_v4  ;;  %v30_v13 = vand.u32 127, %v29_v12  ;;  %v51_v19 = vld [vmem:[%s1641_s2] sm:$0xff]  ;;  %v1087_v35 = vld [vmem:[%s1642_s3 + $0x58] sm:$0xff]  ;;  %v1086_v36 = vld [vmem:[%s1642_s3 + $0x50] sm:$0xff]  ;;  %v1465_v50 = vshrl.u32 %v29_v12, 7  ;;  %vm508_vm6 = vcmask 57344  }
   0x8   :  { %1170 = vmatprep.subr.mxu1 %v47_v6  ;;  %v193_v37 = vld [vmem:[%s1642_s3 + $0x18] sm:$0xff]  ;;  %1205 = vmatprep.subr.mxu0 %v1087_v35  ;;  %v1085_v38 = vld [vmem:[%s1642_s3 + $0x48] sm:$0xff]  ;;  %v192_v39 = vld [vmem:[%s1642_s3 + $0x10] sm:$0xff]  ;;  %vm520_vm7 = vcmask 64512   ;;  %vm838_vm8 = vcmask 254976  }
   0x9   :  { %1171 = vmatpush3.msra.mxu1 %v47_v6  ;;  %1206 = vmatpush3.msra.mxu0 %v1087_v35  ;;  %v1084_v40 = vld [vmem:[%s1642_s3 + $0x40] sm:$0xff]  ;;  %v191_v41 = vld [vmem:[%s1642_s3 + $0x8] sm:$0xff]  ;;  %v1081_v43 = vld [vmem:[%s1642_s3 + $0x38] sm:$0xff]  ;;  %v165_v51 = vsub.s32 0, %v1465_v50  ;;  %v171_v53 = vsub.s32 1, %v1465_v50 }
   0xa   :  { %1172 = vmatprep.subr.mxu1 %v46_v7  ;;  %1207 = vmatprep.subr.mxu0 %v1086_v36  ;;  %v190_v42 = vld [vmem:[%s1642_s3] sm:$0xff]  ;;  %v1080_v3 = vld [vmem:[%s1642_s3 + $0x30] sm:$0xff]  ;;  %v1079_v4 = vld [vmem:[%s1642_s3 + $0x28] sm:$0xff] }
   0xb   :  { %1173 = vmatpush3.msra.mxu1 %v46_v7  ;;  %1208 = vmatpush3.msra.mxu0 %v1086_v36  ;;  %v1471_v52 = vld [vmem:[%s1645_s6] sm:$0x3f] }
   0xc   :  { %1174 = vmatprep.subr.mxu1 %v45_v8  ;;  %1209 = vmatprep.subr.mxu0 %v1085_v38  ;;  %v166_v54 = vrot.slane %v1471_v52, %v165_v51  ;;  %v172_v57 = vrot.slane %v1471_v52, %v171_v53  ;;  %v1078_v5 = vld [vmem:[%s1642_s3 + $0x20] sm:$0xff] }
   0xd   :  { %1175 = vmatpush3.msra.mxu1 %v45_v8  ;;  %1210 = vmatpush3.msra.mxu0 %v1085_v38 }
   0xe   :  { %1176 = vmatprep.subr.mxu1 %v44_v9  ;;  %1211 = vmatprep.subr.mxu0 %v1084_v40 }
   0xf   :  { %1177 = vmatpush3.msra.mxu1 %v44_v9  ;;  %1212 = vmatpush3.msra.mxu0 %v1084_v40  ;;  %v1099_v40 = vld [vmem:[%s1642_s3 + $0x78] sm:$0xff] }
  0x10   :  { %1178 = vmatprep.subr.mxu1 %v43_v10  ;;  %1226 = vmatprep.subr.mxu0 %v1339_v11 }
  0x11   :  { %1179 = vmatpush3.msra.mxu1 %v43_v10 }
  0x12   :  { %1183 = vmatprep.subr.mxu1 %v1339_v11 }
  0x7d   :  { %v33_v14 = vpop.permute.xlu0 %32 }
  0x7e   :  { %vm37_vm1 = vcmp.eq.s32.totalorder %v30_v13, %v33_v14 }
  0x7f   :  { %v1073_v15 = vsel %vm37_vm1, 1.0, %v1339_v11 }
  0x80   :  { %1180 = vmatprep.mubr.msk.f32.mxu1 %vm52_vm0, %v1073_v15 }
  0x81   :  { %v36_v16 = vpop.permute.xlu0 %35 }
  0x82   :  { %vm38_vm2 = vcmp.eq.s32.totalorder %v30_v13, %v36_v16 }
  0x83   :  { %v1074_v17 = vsel %vm38_vm2, 1.0, %v1339_v11 }
  0x84   :  { %1181 = vmatmul.mubr.msk.f32.vlgmr.msra.gmra.mxu1 %vm52_vm0, %v1074_v17 }
  0x85   :  { %1184 = vmatpush3.msra.mxu1 %v193_v37  ;;  %1191 = vmatprep.mubr.msk.f32.mxu1 %vm1340_vm4, %v1339_v11 }
  0x86   :  { %1185 = vmatprep.subr.mxu1 %v1339_v11 }
  0x87   :  { %1186 = vmatpush3.msra.mxu1 %v192_v39 }
  0x88   :  { %1187 = vmatprep.subr.mxu1 %v1339_v11 }
  0x89   :  { %1188 = vmatpush3.msra.mxu1 %v191_v41  ;;  %v1098_v41 = vld [vmem:[%s1642_s3 + $0x70] sm:$0xff] }
  0x8a   :  { %1189 = vmatprep.subr.mxu1 %v1339_v11 }
  0x8b   :  { %1190 = vmatpush3.msra.mxu1 %v190_v42  ;;  %v1097_v42 = vld [vmem:[%s1642_s3 + $0x68] sm:$0xff] }
  0x8c   :  { %1194 = vmatprep.subr.mxu1 %v1081_v43 }
 0x144   :  { %v1182_v18 = vpop.f32.mrf.mxu1 }
 0x145   :  { %v1421_v22 = vadd.f32 %v1182_v18, %v51_v19 }
 0x146   :  { %v125_v20 = vpop.f32.mrf.mxu1 }
 0x147   :  { %v1419_v21 = vadd.f32 %v125_v20, %v51_v19  ;;  %v139_v24 = vsel %vm135_vm3, %v1421_v22, 0.0  ;;  %v187_v53 = vrot.slane %v1421_v22, 6 }
 0x149   :  { %v136_v23 = vsel %vm135_vm3, %v1419_v21, 0.0  ;;  %v184_v51 = vrot.slane %v1419_v21, 7 }
 0x14a   :  { %137 = vadd.xlane.f32.xlu1 %v136_v23 }
 0x14e   :  { %140 = vadd.xlane.f32.xlu1 %v139_v24 }
 0x1d3   :  { %v138_v25 = vpop.xlane.xlu1 %137 }
 0x1d4   :  { %v143_v26 = vmul.f32 0.03125, %v138_v25 }
 0x1d6   :  { %v145_v27 = vsub.f32 %v1419_v21, %v143_v26 }
 0x1d7   :  { %v141_v28 = vpop.xlane.xlu1 %140 }
 0x1d8   :  { %v144_v29 = vmul.f32 0.03125, %v141_v28  ;;  %v147_v30 = vmul.f32 %v145_v27, %v145_v27 }
 0x1da   :  { %v146_v31 = vsub.f32 %v1421_v22, %v144_v29  ;;  %v149_v32 = vsel %vm135_vm3, %v147_v30, 0.0  ;;  %v865_v22 = vld [vmem:[%s1643_s4 + $0x18] sm:$0xff] }
 0x1db   :  { %150 = vadd.xlane.f32.xlu0 %v149_v32 }
 0x1dc   :  { %v148_v33 = vmul.f32 %v146_v31, %v146_v31 }
 0x1de   :  { %v152_v34 = vsel %vm135_vm3, %v148_v33, 0.0 }
 0x1df   :  { %153 = vadd.xlane.f32.xlu1 %v152_v34 }
 0x264   :  { %v151_v44 = vpop.xlane.xlu0 %150 }
 0x265   :  { %v155_v45 = vmul.f32 0.03125, %v151_v44 }
 0x267   :  { %v157_v46 = vadd.f32 1e-05, %v155_v45 }
 0x268   :  { %v154_v47 = vpop.xlane.xlu1 %153 }
 0x269   :  { %1298 = vrsqrt.f32 %v157_v46  ;;  %v156_v48 = vmul.f32 0.03125, %v154_v47 }
 0x26b   :  { %v158_v49 = vadd.f32 1e-05, %v156_v48 }
 0x26d   :  { %1300 = vrsqrt.f32 %v158_v49 }
 0x276   :  { %v1299_v55 = vpop.eup %1298 }
 0x277   :  { %v161_v56 = vmul.f32 %v1299_v55, %v145_v27 }
 0x279   :  { %v167_v58 = vmul.f32 %v166_v54, %v161_v56 }
 0x27a   :  { %v1301_v59 = vpop.eup %1300 }
 0x27b   :  { %v173_v60 = vadd.f32 %v172_v57, %v167_v58  ;;  %v162_v61 = vmul.f32 %v1301_v59, %v146_v31 }
 0x27d   :  { %1213 = vmatprep.mubr.msk.f32.mxu0 %vm135_vm3, %v173_v60  ;;  %v168_v62 = vmul.f32 %v166_v54, %v162_v61  ;;  %v176_v0 = vrot.slane %v173_v60, 7  ;;  %v189_v54 = vsel %vm181_vm5, %v184_v51, %v187_v53 }
 0x27f   :  { %v174_v63 = vadd.f32 %v172_v57, %v168_v62 }
 0x281   :  { %1214 = vmatmul.mubr.msk.f32.vlgmr.msra.gmra.mxu0 %vm135_vm3, %v174_v63  ;;  %v179_v1 = vrot.slane %v174_v63, 6 }
 0x282   :  { %1228 = vmatprep.mubr.msk.f32.mxu0 %vm1340_vm4, %v1339_v11 }
 0x283   :  { %v182_v2 = vsel %vm181_vm5, %v176_v0, %v179_v1  ;;  %v863_v0 = vld [vmem:[%s1643_s4 + $0x8] sm:$0xff]  ;;  %v862_v1 = vld [vmem:[%s1643_s4] sm:$0xff] }
 0x284   :  { %1192 = vmatmul.mubr.msk.f32.vlgmr.msra.gmra.mxu1 %vm135_vm3, %v182_v2 }
 0x285   :  { %1195 = vmatpush3.msra.mxu1 %v1081_v43  ;;  %1202 = vmatprep.mubr.msk.f32.mxu1 %vm135_vm3, %v173_v60  ;;  %v1096_v43 = vld [vmem:[%s1642_s3 + $0x60] sm:$0xff] }
 0x286   :  { %1196 = vmatprep.subr.mxu1 %v1080_v3 }
 0x287   :  { %1197 = vmatpush3.msra.mxu1 %v1080_v3 }
 0x288   :  { %1198 = vmatprep.subr.mxu1 %v1079_v4 }
 0x289   :  { %1199 = vmatpush3.msra.mxu1 %v1079_v4 }
 0x28a   :  { %1200 = vmatprep.subr.mxu1 %v1078_v5 }
 0x28b   :  { %1201 = vmatpush3.msra.mxu1 %v1078_v5  ;;  %v854_v5 = vsub.s32 2, %v1465_v50 }
 0x28c   :  { %1203 = vmatmul.mubr.msk.f32.vlgmr.msra.gmra.mxu1 %vm135_vm3, %v174_v63  ;;  %1216 = vmatprep.subr.mxu1 %v1339_v11  ;;  %v864_v63 = vld [vmem:[%s1643_s4 + $0x10] sm:$0xff] }
 0x28d   :  { %1218 = vmatprep.mubr.msk.f32.mxu1 %vm1340_vm4, %v1339_v11 }
 0x341   :  { %v1215_v9 = vpop.f32.mrf.mxu0 }
 0x343   :  { %v422_v13 = vpop.f32.mrf.mxu0 }
 0x344   :  { %v263_v6 = vpop.f32.mrf.mxu1 }
 0x345   :  { %v594_v10 = vrot.slane %v263_v6, 1 }
 0x346   :  { %v1193_v7 = vpop.f32.mrf.mxu1 }
 0x347   :  { %v855_v7 = vrot.slane %v1471_v52, %v854_v5 }
 0x34c   :  { %v1204_v8 = vpop.f32.mrf.mxu1 }
 0x34d   :  { %1227 = vmatpush3.xpose.msk.msra.mxu0 %vm135_vm3, %v1204_v8 }
 0x34e   :  { %v342_v12 = vpop.f32.mrf.mxu1  ;;  %1236 = vmatprep.subr.mxu0 %v1339_v11 }
 0x34f   :  { %1217 = vmatpush3.xpose.msk.msra.mxu1 %vm135_vm3, %v342_v12 }
 0x350   :  { %1229 = vmatmul.mubr.msk.f32.vlgmr.msra.gmra.mxu0 %vm135_vm3, %v594_v10  ;;  %1221 = vmatprep.subr.mxu1 %v1339_v11 }
 0x351   :  { %1244 = vmatprep.mubr.msk.f32.mxu0 %vm1340_vm4, %v1339_v11  ;;  %1237 = vmatpush3.msra.mxu0 %v1099_v40 }
 0x352   :  { %1219 = vmatmul.mubr.msk.f32.vlgmr.msra.gmra.mxu1 %vm135_vm3, %v263_v6  ;;  %1238 = vmatprep.subr.mxu0 %v1339_v11  ;;  %v859_v6 = vsub.s32 3, %v1465_v50 }
 0x353   :  { %1222 = vmatpush3.msra.mxu1 %v422_v13  ;;  %1223 = vmatprep.mubr.msk.f32.mxu1 %vm1340_vm4, %v1339_v11 }
 0x354   :  { %1231 = vmatprep.subr.mxu1 %v1339_v11  ;;  %1239 = vmatpush3.msra.mxu0 %v1098_v41  ;;  %v860_v10 = vrot.slane %v1471_v52, %v859_v6 }
 0x355   :  { %1240 = vmatprep.subr.mxu0 %v1339_v11 }
 0x356   :  { %1241 = vmatpush3.msra.mxu0 %v1097_v42 }
 0x357   :  { %1242 = vmatprep.subr.mxu0 %v1339_v11 }
 0x358   :  { %1243 = vmatpush3.msra.mxu0 %v1096_v43 }
 0x359   :  { %1258 = vmatprep.subr.mxu0 %v1339_v11 }
 0x410   :  { %v666_v14 = vpop.f32.mrf.mxu0 }
 0x411   :  { %v670_v19 = vmul.f32 0.17677669, %v666_v14  ;;  %v963_v14 = vld [vmem:[%s1644_s5 + $0x78] sm:$0xff] }
 0x412   :  { %v503_v15 = vpop.f32.mrf.mxu1  ;;  %v1230_v16 = vpop.f32.mrf.mxu0 }
 0x413   :  { %v507_v17 = vmul.f32 0.17677669, %v503_v15  ;;  %v671_v23 = vsel %vm508_vm6, %v670_v19, -inf  ;;  %v962_v15 = vld [vmem:[%s1644_s5 + $0x70] sm:$0xff]  ;;  %v961_v16 = vld [vmem:[%s1644_s5 + $0x68] sm:$0xff] }
 0x414   :  { %v1220_v18 = vpop.f32.mrf.mxu1 }
 0x415   :  { %v509_v20 = vsel %vm508_vm6, %v507_v17, -inf  ;;  %v959_v18 = vld [vmem:[%s1644_s5 + $0x58] sm:$0xff] }
 0x416   :  { %510 = vmax.xlane.f32.xlu1 %v509_v20  ;;  %v957_v20 = vld [vmem:[%s1644_s5 + $0x48] sm:$0xff] }
 0x41a   :  { %672 = vmax.xlane.f32.xlu1 %v671_v23  ;;  %v956_v23 = vld [vmem:[%s1644_s5 + $0x40] sm:$0xff] }
 0x49f   :  { %v511_v24 = vpop.xlane.xlu1 %510 }
 0x4a0   :  { %v512_v25 = vsub.f32 %v507_v17, %v511_v24  ;;  %v960_v17 = vld [vmem:[%s1644_s5 + $0x60] sm:$0xff]  ;;  %v955_v24 = vld [vmem:[%s1644_s5 + $0x38] sm:$0xff] }
 0x4a2   :  { %v513_v26 = vmul.f32 1.442695, %v512_v25  ;;  %v954_v25 = vld [vmem:[%s1644_s5 + $0x30] sm:$0xff] }
 0x4a3   :  { %v673_v27 = vpop.xlane.xlu1 %672 }
 0x4a4   :  { %1302 = vpow2.f32 %v513_v26  ;;  %v674_v28 = vsub.f32 %v670_v19, %v673_v27  ;;  %v958_v19 = vld [vmem:[%s1644_s5 + $0x50] sm:$0xff]  ;;  %v953_v26 = vld [vmem:[%s1644_s5 + $0x28] sm:$0xff]  ;;  %v952_v27 = vld [vmem:[%s1644_s5 + $0x20] sm:$0xff] }
 0x4a6   :  { %v675_v29 = vmul.f32 1.442695, %v674_v28  ;;  %v951_v28 = vld [vmem:[%s1644_s5 + $0x18] sm:$0xff] }
 0x4a8   :  { %1304 = vpow2.f32 %v675_v29  ;;  %v950_v29 = vld [vmem:[%s1644_s5 + $0x10] sm:$0xff] }
 0x4b1   :  { %v1303_v30 = vpop.eup %1302 }
 0x4b2   :  { %v515_v31 = vsel %vm508_vm6, %v1303_v30, 0.0 }
 0x4b3   :  { %516 = vadd.xlane.f32.xlu1 %v515_v31  ;;  %v948_v31 = vld [vmem:[%s1644_s5] sm:$0xff] }
 0x4b5   :  { %v1305_v32 = vpop.eup %1304 }
 0x4b6   :  { %v677_v33 = vsel %vm508_vm6, %v1305_v32, 0.0 }
 0x4b7   :  { %678 = vadd.xlane.f32.xlu1 %v677_v33 }
 0x53c   :  { %v517_v34 = vpop.xlane.xlu1 %516 }
 0x53d   :  { %1306 = vrcp.f32 %v517_v34 }
 0x540   :  { %v679_v35 = vpop.xlane.xlu1 %678 }
 0x541   :  { %1308 = vrcp.f32 %v679_v35 }
 0x54a   :  { %v1307_v36 = vpop.eup %1306 }
 0x54b   :  { %v519_v37 = vmul.f32 %v1307_v36, %v1303_v30  ;;  %v949_v30 = vld [vmem:[%s1644_s5 + $0x8] sm:$0xff]  ;;  %s1341_s5 = smov [#allocation2]  }
 0x54c   :  { %s1065_s13 = sshll.u32 %s1341_s5, 4  ;;  %s1066_s13 = int_to_ptr.vmem [resolvable:$true] %s1065_s13 }
 0x54d   :  { %1224 = vmatmul.mubr.msk.f32.vlgmr.msra.gmra.mxu1 %vm520_vm7, %v519_v37  ;;  %s1316_s14 = scalar_lea.vmem %s1066_s13, 32  ;;  %p1321_p1 = scmp.lt.s32.totalorder %s1066_s13, %s1066_s13 }
 0x54e   :  { %v1309_v38 = vpop.eup %1308  ;;  %1232 = vmatpush3.msra.mxu1 %v1215_v9  ;;  %1233 = vmatprep.mubr.msk.f32.mxu1 %vm1340_vm4, %v1339_v11  ;;  %p1317_p0 = scmp.ne.s32.totalorder %s1066_s13, %s1316_s14  ;;  %p1322_p2 = scmp.lt.s32.totalorder %s1316_s14, %s1316_s14 }
 0x54f   :  { %v681_v39 = vmul.f32 %v1309_v38, %v1305_v32  ;;  %1247 = vmatprep.subr.mxu1 %v1339_v11 }
 0x550   :  { %p1323_p3 = por %p1322_p2, %p1321_p1 }
 0x551   :  { %1234 = vmatmul.mubr.msk.f32.vlgmr.msra.gmra.mxu1 %vm520_vm7, %v681_v39 }
 0x552   :  { %1255 = vmatprep.mubr.msk.f32.mxu1 %vm1340_vm4, %v1339_v11  ;;  %1248 = vmatpush3.msra.mxu1 %v865_v22  ;;  %p1324_p4 = pnand %p1323_p3, %p1317_p0 }
 0x553   :  { %1249 = vmatprep.subr.mxu1 %v1339_v11 }
 0x554   :  { %1250 = vmatpush3.msra.mxu1 %v864_v63 }
 0x555   :  { %1251 = vmatprep.subr.mxu1 %v1339_v11 }
 0x556   :  { %1252 = vmatpush3.msra.mxu1 %v863_v0 }
 0x557   :  { %1253 = vmatprep.subr.mxu1 %v1339_v11 }
 0x558   :  { %1254 = vmatpush3.msra.mxu1 %v862_v1 }
 0x60d   :  { %v590_v44 = vpop.f32.mrf.mxu1 }
 0x60f   :  { %v1225_v45 = vpop.f32.mrf.mxu1 }
 0x611   :  { %v751_v46 = vpop.f32.mrf.mxu1 }
 0x612   :  { %v756_v47 = vrot.slane %v751_v46, 7 }
 0x613   :  { %v1235_v48 = vpop.f32.mrf.mxu1 }
 0x614   :  { %v758_v49 = vsel %vm181_vm5, %v590_v44, %v756_v47 }
 0x615   :  { %1245 = vmatmul.mubr.msk.f32.vlgmr.msra.gmra.mxu0 %vm135_vm3, %v758_v49 }
 0x616   :  { %1290 = vmatprep.mubr.msk.f32.mxu0 %vm1340_vm4, %v1339_v11  ;;  %1259 = vmatpush3.msra.mxu0 %v963_v14 }
 0x617   :  { %1260 = vmatprep.subr.mxu0 %v1339_v11 }
 0x618   :  { %1261 = vmatpush3.msra.mxu0 %v962_v15 }
 0x619   :  { %1262 = vmatprep.subr.mxu0 %v1339_v11 }
 0x61a   :  { %1263 = vmatpush3.msra.mxu0 %v961_v16 }
 0x61b   :  { %1264 = vmatprep.subr.mxu0 %v1339_v11 }
 0x61c   :  { %1265 = vmatpush3.msra.mxu0 %v960_v17 }
 0x61d   :  { %1266 = vmatprep.subr.mxu0 %v1339_v11 }
 0x61e   :  { %1267 = vmatpush3.msra.mxu0 %v959_v18 }
 0x61f   :  { %1268 = vmatprep.subr.mxu0 %v1339_v11 }
 0x620   :  { %1269 = vmatpush3.msra.mxu0 %v958_v19 }
 0x621   :  { %1270 = vmatprep.subr.mxu0 %v1339_v11 }
 0x622   :  { %1271 = vmatpush3.msra.mxu0 %v957_v20 }
 0x623   :  { %1272 = vmatprep.subr.mxu0 %v1339_v11 }
 0x624   :  { %1273 = vmatpush3.msra.mxu0 %v956_v23 }
 0x625   :  { %1274 = vmatprep.subr.mxu0 %v1339_v11 }
 0x626   :  { %1275 = vmatpush3.msra.mxu0 %v955_v24 }
 0x627   :  { %1276 = vmatprep.subr.mxu0 %v1339_v11 }
 0x628   :  { %1277 = vmatpush3.msra.mxu0 %v954_v25 }
 0x629   :  { %1278 = vmatprep.subr.mxu0 %v1339_v11 }
 0x62a   :  { %1279 = vmatpush3.msra.mxu0 %v953_v26 }
 0x62b   :  { %1280 = vmatprep.subr.mxu0 %v1339_v11 }
 0x62c   :  { %1281 = vmatpush3.msra.mxu0 %v952_v27 }
 0x62d   :  { %1282 = vmatprep.subr.mxu0 %v1339_v11 }
 0x62e   :  { %1283 = vmatpush3.msra.mxu0 %v951_v28 }
 0x62f   :  { %1284 = vmatprep.subr.mxu0 %v1339_v11 }
 0x630   :  { %1285 = vmatpush3.msra.mxu0 %v950_v29 }
 0x631   :  { %1286 = vmatprep.subr.mxu0 %v1339_v11 }
 0x632   :  { %1287 = vmatpush3.msra.mxu0 %v949_v30 }
 0x633   :  { %1288 = vmatprep.subr.mxu0 %v1339_v11 }
 0x634   :  { %1289 = vmatpush3.msra.mxu0 %v948_v31 }
 0x6d5   :  { %v833_v55 = vpop.f32.mrf.mxu0 }
 0x6d6   :  { %v1539_v56 = vadd.f32 %v833_v55, %v189_v54 }
 0x6d7   :  { %v1246_v57 = vpop.f32.mrf.mxu0 }
 0x6d8   :  { %v839_v58 = vsel %vm838_vm8, %v1539_v56, 0.0  ;;  %v1050_v57 = vsub.s32 4, %v1465_v50 }
 0x6d9   :  { %840 = vadd.xlane.f32.xlu1 %v839_v58  ;;  %v1055_v58 = vsub.s32 5, %v1465_v50 }
 0x762   :  { %v841_v59 = vpop.xlane.xlu1 %840 }
 0x763   :  { %v842_v60 = vmul.f32 0.03125, %v841_v59 }
 0x765   :  { %v843_v61 = vsub.f32 %v1539_v56, %v842_v60 }
 0x767   :  { %v844_v62 = vmul.f32 %v843_v61, %v843_v61 }
 0x769   :  { %v845_v21 = vsel %vm838_vm8, %v844_v62, 0.0 }
 0x76a   :  { %846 = vadd.xlane.f32.xlu1 %v845_v21 }
 0x7f3   :  { %v847_v2 = vpop.xlane.xlu1 %846 }
 0x7f4   :  { %v848_v3 = vmul.f32 0.03125, %v847_v2 }
 0x7f6   :  { %v849_v4 = vadd.f32 1e-05, %v848_v3 }
 0x7f8   :  { %1310 = vrsqrt.f32 %v849_v4 }
 0x805   :  { %v1311_v8 = vpop.eup %1310 }
 0x806   :  { %v851_v9 = vmul.f32 %v1311_v8, %v843_v61  ;;  %v1056_v61 = vrot.slane %v1471_v52, %v1055_v58 }
 0x808   :  { %v856_v12 = vmul.f32 %v855_v7, %v851_v9 }
 0x80a   :  { %v861_v13 = vadd.f32 %v860_v10, %v856_v12 }
 0x80c   :  { %1256 = vmatmul.mubr.msk.f32.vlgmr.msra.gmra.mxu1 %vm135_vm3, %v861_v13 }
 0x8cc   :  { %v935_v32 = vpop.f32.mrf.mxu1 }
 0x8cd   :  { %v939_v33 = vmul.f32 %v935_v32, %v935_v32 }
 0x8ce   :  { %v1257_v34 = vpop.f32.mrf.mxu1 }
 0x8cf   :  { %v940_v35 = vmul.f32 %v939_v33, %v935_v32 }
 0x8d1   :  { %v941_v36 = vmul.f32 0.044715, %v940_v35 }
 0x8d3   :  { %v942_v37 = vadd.f32 %v941_v36, %v935_v32 }
 0x8d5   :  { %v943_v38 = vmul.f32 0.7978846, %v942_v37 }
 0x8d7   :  { %1312 = vtanh.f32 %v943_v38 }
 0x8e4   :  { %v1313_v39 = vpop.eup %1312 }
 0x8e5   :  { %v945_v40 = vadd.f32 1.0, %v1313_v39 }
 0x8e7   :  { %v946_v41 = vmul.f32 0.5, %v945_v40 }
 0x8e9   :  { %v947_v42 = vmul.f32 %v946_v41, %v935_v32 }
 0x8eb   :  { %1291 = vmatmul.mubr.f32.vlgmr.msra.gmra.mxu0 %v947_v42 }
 0x9ab   :  { %v1030_v43 = vpop.f32.mrf.mxu0 }
 0x9ac   :  { %v1034_v44 = vadd.f32 %v1030_v43, %v1539_v56  ;;  %v1051_v56 = vrot.slane %v1471_v52, %v1050_v57 }
 0x9ad   :  { %v1292_v45 = vpop.f32.mrf.mxu0 }
 0x9ae   :  { %v1035_v11 = vsel %vm838_vm8, %v1034_v44, 0.0 }
 0x9af   :  { %1036 = vadd.xlane.f32.xlu1 %v1035_v11 }
 0xa38   :  { %v1037_v46 = vpop.xlane.xlu1 %1036 }
 0xa39   :  { %v1038_v47 = vmul.f32 0.03125, %v1037_v46 }
 0xa3b   :  { %v1039_v48 = vsub.f32 %v1034_v44, %v1038_v47 }
 0xa3d   :  { %v1040_v49 = vmul.f32 %v1039_v48, %v1039_v48 }
 0xa3f   :  { %v1041_v51 = vsel %vm838_vm8, %v1040_v49, 0.0 }
 0xa40   :  { %1042 = vadd.xlane.f32.xlu0 %v1041_v51 }
 0xac9   :  { %v1043_v53 = vpop.xlane.xlu0 %1042 }
 0xaca   :  { %v1044_v54 = vmul.f32 0.03125, %v1043_v53 }
 0xacc   :  { %v1045_v55 = vadd.f32 1e-05, %v1044_v54 }
 0xace   :  { %1314 = vrsqrt.f32 %v1045_v55 }
 0xadb   :  { %v1315_v59 = vpop.eup %1314 }
 0xadc   :  { %v1047_v60 = vmul.f32 %v1315_v59, %v1039_v48 }
 0xade   :  { %v1052_v62 = vmul.f32 %v1051_v56, %v1047_v60 }
 0xae0   :  { %v1057_v21 = vadd.f32 %v1056_v61, %v1052_v62 }
 0xae2   :  { %1058 = vst.msk [vmem:[#allocation2] sm:$0x3] %vm838_vm8, %v1057_v21 }
 0xae3   :  { %1327 = shalt.err (!%p1324_p4)
}
 0xae4   :  { %1068 = dma.vmem_to_hbm [thread:$0]  %s1066_s13, 32, %s1646_s7, [#allocation3]  }
 0xae5   :  { %1336 = dma.done.wait [#allocation3], 32  }
 0xae6   :  { %1337 = vsyncadd [#allocation3], 4294967264 }
 0xae7   :  { %1072 = vsyncpa [#allocation3], 1 }

</bundles_post_ra>
